<compile_context>
chip_gen: v5e
topology: v5e:2x2
jax: 0.10.0
libtpu: 0.0.40
codegen_flags: <defaults>
</compile_context>

<pallas_src>
import jax
import jax.numpy as jnp
from jax.experimental import pallas as pl
from jax.experimental.pallas import tpu as pltpu

_TARGET_TILE_BYTES = 2 * 1024 * 1024       # per-input tile (~2 MiB)
_LANE_CANDIDATES = (4096, 2048, 1024, 512, 256, 128)
_SMALL_FALLBACK_ELEMS = 1 << 16            # below this, pallas_call overhead dominates


def _fusion_math(x, y):
    diff = x - y
    s = x + y
    zero = jnp.zeros((), dtype=s.dtype)    # dtype-matched; avoids f32 upcast for bf16
    return -(diff * diff) + jnp.maximum(s, zero)


def _fusion_kernel(x_ref, y_ref, o_ref):
    o_ref[...] = _fusion_math(x_ref[...], y_ref[...])


def fusion(x: jax.Array, y: jax.Array, *, force_pallas: bool = False) -> jax.Array:
    """Computes -(x - y)**2 + relu(x + y) with a Pallas TPU kernel."""
    assert x.shape == y.shape and x.dtype == y.dtype
    orig_shape = x.shape
    n = x.size
    itemsize = jnp.dtype(x.dtype).itemsize

    if n == 0:
        return x
    if (not force_pallas) and n < _SMALL_FALLBACK_ELEMS:
        # Tiny tensors: plain jnp (XLA fuses this elementwise op for free).
        return _fusion_math(x, y)

    xf = x.reshape(-1)
    yf = y.reshape(-1)

    # Widest lane-dense slab width that divides n exactly -> no pad copy needed.
    lanes = None
    for cand in _LANE_CANDIDATES:
        if n % cand == 0:
            lanes = cand
            break

    padded = n
    if lanes is None:
        # Rare odd size: pad minimally (still produces a wide lane dim).
        lanes = 1024
        padded = pl.cdiv(n, lanes) * lanes
        pad = padded - n
        xf = jnp.pad(xf, (0, pad))
        yf = jnp.pad(yf, (0, pad))

    rows = padded // lanes
    x2 = xf.reshape(rows, lanes)
    y2 = yf.reshape(rows, lanes)

    # Sublane multiple: 8 for 32-bit, 16 for 16-bit, 32 for 8-bit dtypes.
    sub_mult = max(8, 32 // itemsize)
    row_tile = (_TARGET_TILE_BYTES // (lanes * itemsize)) // sub_mult * sub_mult
    row_tile = max(row_tile, sub_mult)
    if row_tile >= rows:
        row_tile = rows  # full-extent block along rows (always legal)

    grid = (pl.cdiv(rows, row_tile),)
    spec = pl.BlockSpec((row_tile, lanes), lambda i: (i, 0))

    out2 = pl.pallas_call(
        _fusion_kernel,
        out_shape=jax.ShapeDtypeStruct((rows, lanes), x.dtype),
        grid_spec=pltpu.PrefetchScalarGridSpec(
            num_scalar_prefetch=0,
            grid=grid,
            in_specs=[spec, spec],
            out_specs=spec,
        ),
        compiler_params=pltpu.CompilerParams(
            dimension_semantics=("parallel",),
        ),
        cost_estimate=pl.CostEstimate(
            flops=5 * n,
            transcendentals=0,
            bytes_accessed=3 * n * itemsize,
        ),
    )(x2, y2)

    out_flat = out2.reshape(-1)
    if padded != n:
        out_flat = out_flat[:n]
    return out_flat.reshape(orig_shape)


if __name__ == "__main__":
    key = jax.random.PRNGKey(0)
    k1, k2, k3, k4 = jax.random.split(key, 4)

    # Small NCHW case (batch=2, channels=4, spatial=16x16).  Force the Pallas
    # path so the kernel itself is exercised on-device.
    x_s = jax.random.normal(k1, (2, 4, 16, 16), dtype=jnp.float32)
    y_s = jax.random.normal(k2, (2, 4, 16, 16), dtype=jnp.float32)
    out_s = fusion(x_s, y_s, force_pallas=True)
    jax.block_until_ready(out_s)
    ref_s = _fusion_math(x_s, y_s)
    assert out_s.shape == ref_s.shape
    assert jnp.allclose(out_s, ref_s, atol=1e-5, rtol=1e-5)

    # Default path on tiny input takes the plain-jnp fallback.
    out_fb = fusion(x_s, y_s)
    assert jnp.allclose(out_fb, ref_s, atol=1e-5, rtol=1e-5)

    # Moderate case that takes the tiled streaming Pallas path by default.
    x_m = jax.random.normal(k3, (2, 8, 64, 128), dtype=jnp.float32)
    y_m = jax.random.normal(k4, (2, 8, 64, 128), dtype=jnp.float32)
    out_m = fusion(x_m, y_m)
    jax.block_until_ready(out_m)
    ref_m = _fusion_math(x_m, y_m)
    assert out_m.shape == ref_m.shape
    assert jnp.allclose(out_m, ref_m, atol=1e-5, rtol=1e-5)

    print("KERNEL_OK")
</pallas_src>

<mosaic_0001>
module attributes {stable_mosaic.version = 11 : i64} {
  func.func @_fusion_kernel(%arg0: i32, %arg1: memref<1x2048xf32, #tpu.memory_space<vmem>>, %arg2: memref<1x2048xf32, #tpu.memory_space<vmem>>, %arg3: memref<1x2048xf32, #tpu.memory_space<vmem>>) attributes {dimension_semantics = [#tpu.dimension_semantics<parallel>], iteration_bounds = array<i64: 1>, scalar_prefetch = 0 : i64, scratch_operands = 0 : i64, tpu.core_type = #tpu.core_type<tc>, window_params = [{transform_indices = @transform_0, window_bounds = array<i64: 1, 2048>}, {transform_indices = @transform_1, window_bounds = array<i64: 1, 2048>}, {transform_indices = @transform_2, window_bounds = array<i64: 1, 2048>}]} {
    %c0 = arith.constant 0 : index
    %c0_0 = arith.constant 0 : index
    %0 = vector.load %arg1[%c0, %c0_0] : memref<1x2048xf32, #tpu.memory_space<vmem>>, vector<1x2048xf32>
    %c0_1 = arith.constant 0 : index
    %c0_2 = arith.constant 0 : index
    %1 = vector.load %arg2[%c0_1, %c0_2] : memref<1x2048xf32, #tpu.memory_space<vmem>>, vector<1x2048xf32>
    %2 = arith.subf %0, %1 : vector<1x2048xf32>
    %3 = arith.addf %0, %1 : vector<1x2048xf32>
    %4 = arith.mulf %2, %2 : vector<1x2048xf32>
    %cst = arith.constant 0.000000e+00 : f32
    %5 = vector.broadcast %cst : f32 to vector<1x2048xf32>
    %6 = arith.subf %5, %4 : vector<1x2048xf32>
    %cst_3 = arith.constant 0.000000e+00 : f32
    %7 = vector.broadcast %cst_3 : f32 to vector<1x2048xf32>
    %8 = arith.maximumf %3, %7 : vector<1x2048xf32>
    %9 = arith.addf %6, %8 : vector<1x2048xf32>
    %c0_4 = arith.constant 0 : index
    %c0_5 = arith.constant 0 : index
    %10 = vector.load %arg3[%c0_4, %c0_5] : memref<1x2048xf32, #tpu.memory_space<vmem>>, vector<1x2048xf32>
    tpu.vector_store %arg3[%c0_4, %c0_5], %9 {strides = array<i32>} : memref<1x2048xf32, #tpu.memory_space<vmem>>, vector<1x2048xf32>,
    return
  }
  func.func @transform_0(%arg0: i32) -> (i32, i32) {
    %c0_i32 = arith.constant 0 : i32
    %c0_i32_0 = arith.constant 0 : i32
    return %arg0, %c0_i32 : i32, i32
  }
  func.func @transform_1(%arg0: i32) -> (i32, i32) {
    %c0_i32 = arith.constant 0 : i32
    %c0_i32_0 = arith.constant 0 : i32
    return %arg0, %c0_i32 : i32, i32
  }
  func.func @transform_2(%arg0: i32) -> (i32, i32) {
    %c0_i32 = arith.constant 0 : i32
    %c0_i32_0 = arith.constant 0 : i32
    return %arg0, %c0_i32 : i32, i32
  }
}

</mosaic_0001>

<bundles_post_ra>
// kernel: tpu_custom_call.1
= control target key start
LH: loop header
LB: loop body
LE: loop exit
PB: predicated region body
PF: predicated region fallthrough
CT: control target
= control target key end

     0   :  { %7 = vsyncpa [#allocation3], 0  ;;  %s184_s0 = inlined_call_operand.hbm [shape: f32[1,2048], index: 0, kind: input, shape index: {}]   ;;  %s185_s1 = inlined_call_operand.hbm [shape: f32[1,2048], index: 1, kind: input, shape index: {}]   ;;  %s186_s2 = inlined_call_operand.hbm [shape: f32[1,2048], index: 2, kind: output, shape index: {}]  }
   0x1   :  { %8 = vsyncpa [#allocation6], 0 }
   0x2   :  { %9 = vsyncpa [#allocation4], 0  ;;  %s15_s11 = sshll.u32 %s184_s0, 4  ;;  %s157_s12 = smov [#allocation2]   ;;  %s16_s11 = int_to_ptr.hbm [resolvable:$true] %s15_s11 }
   0x3   :  { %s17_s13 = sshll.u32 %s157_s12, 4  ;;  %s26_s16 = sshll.u32 %s185_s1, 4  ;;  %s18_s13 = int_to_ptr.vmem [resolvable:$true] %s17_s13  ;;  %s27_s16 = int_to_ptr.hbm [resolvable:$true] %s26_s16 }
   0x4   :  { %20 = dma.hbm_to_vmem [thread:$0]  %s16_s11, 256, %s18_s13, [#allocation3]  }
   0x5   :  { %s158_s17 = smov [#allocation5]  }
   0x6   :  { %s28_s18 = sshll.u32 %s158_s17, 4  ;;  %s29_s18 = int_to_ptr.vmem [resolvable:$true] %s28_s18 }
   0x7   :  { %31 = dma.hbm_to_vmem [thread:$0]  %s27_s16, 256, %s29_s18, [#allocation6]  }
   0x8   :  { %151 = dma.done.wait [#allocation3], 256  }
   0x9   :  { %152 = vsyncadd [#allocation3], 4294967040 }
   0xa   :  { %153 = dma.done.wait [#allocation6], 256  }
   0xb   :  { %154 = vsyncadd [#allocation6], 4294967040  ;;  %v40_v0 = vld [vmem:[#allocation2] sm:$0xff]  ;;  %v42_v1 = vld [vmem:[#allocation5] sm:$0xff]  ;;  %s159_s0 = smov [#allocation7]   ;;  %s65_s21 = sshll.u32 %s186_s2, 4  ;;  %s66_s21 = int_to_ptr.hbm [resolvable:$true] %s65_s21 }
   0xc   :  { %v41_v2 = vld [vmem:[#allocation2 + $0x8] sm:$0xff]  ;;  %v44_v3 = vsub.f32 %v40_v0, %v42_v1  ;;  %v46_v4 = vadd.f32 %v42_v1, %v40_v0  ;;  %v43_v5 = vld [vmem:[#allocation5 + $0x8] sm:$0xff]  ;;  %s63_s1 = sshll.u32 %s159_s0, 4  ;;  %s64_s1 = int_to_ptr.vmem [resolvable:$true] %s63_s1 }
   0xd   :  { %v45_v6 = vsub.f32 %v41_v2, %v43_v5  ;;  %v47_v7 = vadd.f32 %v43_v5, %v41_v2 }
   0xe   :  { %v48_v8 = vmul.f32 %v44_v3, %v44_v3  ;;  %v52_v9 = vmax.f32 %v46_v4, 0.0 }
   0xf   :  { %v49_v10 = vmul.f32 %v45_v6, %v45_v6  ;;  %v53_v11 = vmax.f32 %v47_v7, 0.0 }
  0x10   :  { %v50_v12 = vsub.f32 0.0, %v48_v8 }
  0x11   :  { %v51_v13 = vsub.f32 0.0, %v49_v10 }
  0x12   :  { %v54_v14 = vadd.f32 %v52_v9, %v50_v12 }
  0x13   :  { %v55_v15 = vadd.f32 %v53_v11, %v51_v13 }
  0x14   :  { %56 = vst [vmem:[#allocation7] sm:$0xff] %v54_v14 }
  0x15   :  { %57 = vst [vmem:[#allocation7 + $0x8] sm:$0xff] %v55_v15 }
  0x16   :  { %68 = dma.vmem_to_hbm [thread:$0]  %s64_s1, 256, %s66_s21, [#allocation4]  }
  0x17   :  { %155 = dma.done.wait [#allocation4], 256  }
  0x18   :  { %156 = vsyncadd [#allocation4], 4294967040 }
  0x19   :  { %73 = vsyncpa [#allocation3], 1 }
  0x1a   :  { %74 = vsyncpa [#allocation6], 1 }
  0x1b   :  { %75 = vsyncpa [#allocation4], 1 }

</bundles_post_ra>
